<compile_context>
chip_gen: v7x
topology: tpu7x:2x2x1
jax: 0.10.0
libtpu: 0.0.40
codegen_flags: <defaults>
</compile_context>

<pallas_src>
import random
import functools

import jax
import jax.numpy as jnp
from jax.experimental import pallas as pl
from jax.experimental.pallas import tpu as pltpu

INPUT_SIZE = 4
OUTPUT_SIZE = 1
LANE = 128      # lane width / padded feature dim (all dims here are <= 40)
SUBLANE = 8     # sublane granularity for the batch axis


def _round_up(x, m):
    return ((x + m - 1) // m) * m


def generate_random_ffn_architecture(max_neurons, seed=0):
    """Deterministic stand-in for the module's random architecture generator."""
    rng = random.Random(seed)
    n_layers = rng.randint(1, 3)
    arch = []
    remaining = max_neurons
    for _ in range(n_layers):
        if remaining < 1:
            break
        size = rng.randint(1, max(1, remaining // 2) if remaining > 1 else 1)
        arch.append(size)
        remaining -= size
    return arch


def make_params(layer_sizes, key):
    """Deterministic weight/bias init (stand-in for the module's random init)."""
    params = []
    for i in range(len(layer_sizes) - 1):
        in_size, out_size = layer_sizes[i], layer_sizes[i + 1]
        key, kw, kb = jax.random.split(key, 3)
        # Stored PyTorch-style as (out, in); transposed when packing for the kernel.
        w = jax.random.uniform(kw, (out_size, in_size), jnp.float32, -1.0, 1.0)
        b = jax.random.uniform(kb, (out_size,), jnp.float32, -1.0, 1.0)
        params.append((w, b))
    return params


def pack_params(params):
    """Pack all layers into zero-padded slabs:
         w_packed: (L, LANE, LANE)  laid out as (in, out) per layer
         b_packed: (L, 1, LANE)
       Padded rows/cols/lanes are exactly zero so padded lanes stay zero
       through bias-add and ReLU (correctness preserved)."""
    L = len(params)
    w_packed = jnp.zeros((L, LANE, LANE), jnp.float32)
    b_packed = jnp.zeros((L, 1, LANE), jnp.float32)
    for i, (w, b) in enumerate(params):
        out_size, in_size = w.shape
        w_packed = w_packed.at[i, :in_size, :out_size].set(
            jnp.asarray(w.T, jnp.float32))
        b_packed = b_packed.at[i, 0, :out_size].set(jnp.asarray(b, jnp.float32))
    return w_packed, b_packed


def _mlp_kernel(num_layers, x_ref, w_ref, b_ref, o_ref):
    """x_ref: (TB, LANE), w_ref: (L, LANE, LANE), b_ref: (L, 1, LANE),
       o_ref: (TB, LANE). Whole layer chain in one kernel body."""
    h = x_ref[...]
    for i in range(num_layers):              # static unroll over layers
        h = jnp.dot(h, w_ref[i], preferred_element_type=jnp.float32)
        h = h + b_ref[i]
        if i < num_layers - 1:
            h = jnp.maximum(h, 0.0)          # ReLU on all but last layer
    o_ref[...] = h.astype(o_ref.dtype)


def mlp_forward(x, params):
    """Run the full MLP forward pass in a single Pallas kernel call.

    x: (B, INPUT_SIZE) f32. Returns (B, OUTPUT_SIZE) f32.
    """
    num_layers = len(params)
    batch = x.shape[0]

    # --- pad batch (sublanes) and features (lanes) ---
    b_pad8 = _round_up(batch, SUBLANE)
    TB = min(512, b_pad8)                    # measured sweet spot for big B
    B_pad = _round_up(b_pad8, TB)
    x_pad = jnp.zeros((B_pad, LANE), jnp.float32)
    x_pad = x_pad.at[:batch, :x.shape[1]].set(jnp.asarray(x, jnp.float32))

    w_packed, b_packed = pack_params(params)

    kernel = functools.partial(_mlp_kernel, num_layers)
    grid = (B_pad // TB,)

    out_padded = pl.pallas_call(
        kernel,
        out_shape=jax.ShapeDtypeStruct((B_pad, LANE), jnp.float32),
        grid=grid,
        in_specs=[
            pl.BlockSpec((TB, LANE), lambda i: (i, 0)),                 # x tile
            pl.BlockSpec((num_layers, LANE, LANE), lambda i: (0, 0, 0)),  # weights
            pl.BlockSpec((num_layers, 1, LANE), lambda i: (0, 0, 0)),     # biases
        ],
        out_specs=pl.BlockSpec((TB, LANE), lambda i: (i, 0)),
        compiler_params=pltpu.CompilerParams(
            dimension_semantics=("parallel",)),
    )(x_pad, w_packed, b_packed)

    # Slice back to the logical output shape.
    return out_padded[:batch, :OUTPUT_SIZE]


def reference_forward(x, params):
    """Plain-JAX reference matching the PyTorch forward semantics."""
    h = x
    for i, (w, b) in enumerate(params):
        h = h @ w.T + b
        if i < len(params) - 1:
            h = jnp.maximum(h, 0.0)
    return h


if __name__ == "__main__":
    architecture = generate_random_ffn_architecture(40)
    layer_sizes = [INPUT_SIZE] + architecture + [OUTPUT_SIZE]

    key = jax.random.PRNGKey(0)
    key, kx = jax.random.split(key)
    params = make_params(layer_sizes, key)

    batch = 8
    x = jax.random.normal(kx, (batch, INPUT_SIZE), jnp.float32)

    out = mlp_forward(x, params)
    out = jax.block_until_ready(out)

    ref = reference_forward(x, params)
    assert out.shape == (batch, OUTPUT_SIZE), out.shape
    assert jnp.allclose(out, ref, atol=1e-4, rtol=1e-4), (out, ref)

    print("KERNEL_OK")
</pallas_src>

<mosaic_0001>
module attributes {stable_mosaic.version = 11 : i64} {
  func.func @_mlp_kernel(%arg0: i32, %arg1: memref<8x128xf32, #tpu.memory_space<vmem>>, %arg2: memref<3x128x128xf32, #tpu.memory_space<vmem>>, %arg3: memref<3x1x128xf32, #tpu.memory_space<vmem>>, %arg4: memref<8x128xf32, #tpu.memory_space<vmem>>) attributes {dimension_semantics = [#tpu.dimension_semantics<parallel>], iteration_bounds = array<i64: 1>, scalar_prefetch = 0 : i64, scratch_operands = 0 : i64, tpu.core_type = #tpu.core_type<tc>, window_params = [{transform_indices = @transform_0, window_bounds = array<i64: 8, 128>}, {pipeline_mode = #tpu.pipeline_mode<synchronous>, transform_indices = @transform_1, window_bounds = array<i64: 3, 128, 128>}, {pipeline_mode = #tpu.pipeline_mode<synchronous>, transform_indices = @transform_2, window_bounds = array<i64: 3, 1, 128>}, {transform_indices = @transform_3, window_bounds = array<i64: 8, 128>}]} {
    %c0 = arith.constant 0 : index
    %c0_0 = arith.constant 0 : index
    %0 = vector.load %arg1[%c0, %c0_0] : memref<8x128xf32, #tpu.memory_space<vmem>>, vector<8x128xf32>
    %c0_1 = arith.constant 0 : index
    %c0_2 = arith.constant 0 : index
    %c0_3 = arith.constant 0 : index
    %1 = vector.load %arg2[%c0_1, %c0_2, %c0_3] : memref<3x128x128xf32, #tpu.memory_space<vmem>>, vector<1x128x128xf32>
    %2 = vector.shape_cast %1 : vector<1x128x128xf32> to vector<128x128xf32>
    %cst = arith.constant dense<0.000000e+00> : vector<8x128xf32>
    %3 = tpu.matmul %0, %2, %cst {dimension_numbers = #tpu.dot_dimension_numbers<[1], [0], [0], [1], [0, 0, 1, 1], [], []>} : vector<8x128xf32>, vector<128x128xf32>, vector<8x128xf32> -> vector<8x128xf32>
    %c0_4 = arith.constant 0 : index
    %c0_5 = arith.constant 0 : index
    %c0_6 = arith.constant 0 : index
    %4 = vector.load %arg3[%c0_4, %c0_5, %c0_6] : memref<3x1x128xf32, #tpu.memory_space<vmem>>, vector<1x1x128xf32>
    %5 = vector.shape_cast %4 : vector<1x1x128xf32> to vector<1x128xf32>
    %6 = vector.broadcast %5 : vector<1x128xf32> to vector<8x128xf32>
    %7 = arith.addf %3, %6 : vector<8x128xf32>
    %cst_7 = arith.constant 0.000000e+00 : f32
    %8 = vector.broadcast %cst_7 : f32 to vector<8x128xf32>
    %9 = arith.maximumf %7, %8 : vector<8x128xf32>
    %c1 = arith.constant 1 : index
    %c0_8 = arith.constant 0 : index
    %c0_9 = arith.constant 0 : index
    %10 = vector.load %arg2[%c1, %c0_8, %c0_9] : memref<3x128x128xf32, #tpu.memory_space<vmem>>, vector<1x128x128xf32>
    %11 = vector.shape_cast %10 : vector<1x128x128xf32> to vector<128x128xf32>
    %cst_10 = arith.constant dense<0.000000e+00> : vector<8x128xf32>
    %12 = tpu.matmul %9, %11, %cst_10 {dimension_numbers = #tpu.dot_dimension_numbers<[1], [0], [0], [1], [0, 0, 1, 1], [], []>} : vector<8x128xf32>, vector<128x128xf32>, vector<8x128xf32> -> vector<8x128xf32>
    %c1_11 = arith.constant 1 : index
    %c0_12 = arith.constant 0 : index
    %c0_13 = arith.constant 0 : index
    %13 = vector.load %arg3[%c1_11, %c0_12, %c0_13] : memref<3x1x128xf32, #tpu.memory_space<vmem>>, vector<1x1x128xf32>
    %14 = vector.shape_cast %13 : vector<1x1x128xf32> to vector<1x128xf32>
    %15 = vector.broadcast %14 : vector<1x128xf32> to vector<8x128xf32>
    %16 = arith.addf %12, %15 : vector<8x128xf32>
    %cst_14 = arith.constant 0.000000e+00 : f32
    %17 = vector.broadcast %cst_14 : f32 to vector<8x128xf32>
    %18 = arith.maximumf %16, %17 : vector<8x128xf32>
    %c2 = arith.constant 2 : index
    %c0_15 = arith.constant 0 : index
    %c0_16 = arith.constant 0 : index
    %19 = vector.load %arg2[%c2, %c0_15, %c0_16] : memref<3x128x128xf32, #tpu.memory_space<vmem>>, vector<1x128x128xf32>
    %20 = vector.shape_cast %19 : vector<1x128x128xf32> to vector<128x128xf32>
    %cst_17 = arith.constant dense<0.000000e+00> : vector<8x128xf32>
    %21 = tpu.matmul %18, %20, %cst_17 {dimension_numbers = #tpu.dot_dimension_numbers<[1], [0], [0], [1], [0, 0, 1, 1], [], []>} : vector<8x128xf32>, vector<128x128xf32>, vector<8x128xf32> -> vector<8x128xf32>
    %c2_18 = arith.constant 2 : index
    %c0_19 = arith.constant 0 : index
    %c0_20 = arith.constant 0 : index
    %22 = vector.load %arg3[%c2_18, %c0_19, %c0_20] : memref<3x1x128xf32, #tpu.memory_space<vmem>>, vector<1x1x128xf32>
    %23 = vector.shape_cast %22 : vector<1x1x128xf32> to vector<1x128xf32>
    %24 = vector.broadcast %23 : vector<1x128xf32> to vector<8x128xf32>
    %25 = arith.addf %21, %24 : vector<8x128xf32>
    %c0_21 = arith.constant 0 : index
    %c0_22 = arith.constant 0 : index
    %26 = vector.load %arg4[%c0_21, %c0_22] : memref<8x128xf32, #tpu.memory_space<vmem>>, vector<8x128xf32>
    tpu.vector_store %arg4[%c0_21, %c0_22], %25 {strides = array<i32>} : memref<8x128xf32, #tpu.memory_space<vmem>>, vector<8x128xf32>,
    return
  }
  func.func @transform_0(%arg0: i32) -> (i32, i32) {
    %c0_i32 = arith.constant 0 : i32
    %c0_i32_0 = arith.constant 0 : i32
    return %arg0, %c0_i32 : i32, i32
  }
  func.func @transform_1(%arg0: i32) -> (i32, i32, i32) {
    %c0_i32 = arith.constant 0 : i32
    %c0_i32_0 = arith.constant 0 : i32
    %c0_i32_1 = arith.constant 0 : i32
    %c0_i32_2 = arith.constant 0 : i32
    return %c0_i32, %c0_i32_0, %c0_i32_1 : i32, i32, i32
  }
  func.func @transform_2(%arg0: i32) -> (i32, i32, i32) {
    %c0_i32 = arith.constant 0 : i32
    %c0_i32_0 = arith.constant 0 : i32
    %c0_i32_1 = arith.constant 0 : i32
    %c0_i32_2 = arith.constant 0 : i32
    return %c0_i32, %c0_i32_0, %c0_i32_1 : i32, i32, i32
  }
  func.func @transform_3(%arg0: i32) -> (i32, i32) {
    %c0_i32 = arith.constant 0 : i32
    %c0_i32_0 = arith.constant 0 : i32
    return %arg0, %c0_i32 : i32, i32
  }
}

</mosaic_0001>

<bundles_post_ra>
// kernel: tpu_custom_call.1
= control target key start
LH: loop header
LB: loop body
LE: loop exit
PB: predicated region body
PF: predicated region fallthrough
CT: control target
= control target key end

     0   :  { %8 = vsyncpa [#allocation3], 0  ;;  %s767_s0 = inlined_call_operand.hbm [shape: f32[8,128], index: 0, kind: input, shape index: {}]   ;;  %s768_s1 = inlined_call_operand.hbm [shape: f32[3,128,128], index: 1, kind: input, shape index: {}]   ;;  %s769_s2 = inlined_call_operand.vmem [shape: f32[3,1,128], index: 2, kind: input, shape index: {}]   ;;  %s770_s3 = inlined_call_operand.hbm [shape: f32[8,128], index: 3, kind: output, shape index: {}]  }
   0x1   :  { %9 = vsyncpa [#allocation6], 0 }
   0x2   :  { %10 = vsyncpa [#allocation4], 0  ;;  %s657_s12 = smov [#allocation2]   ;;  %s658_s14 = smov [#allocation5]  }
   0x3   :  { %s17_s13 = sshll.u32 %s657_s12, 4  ;;  %s26_s15 = sshll.u32 %s658_s14, 4  ;;  %s18_s13 = int_to_ptr.vmem [resolvable:$true] %s17_s13  ;;  %s685_s15 = int_to_ptr.vmem [resolvable:$true] %s26_s15 }
   0x4   :  { %s585_s18 = scalar_lea.hbm %s767_s0, 128 }
   0x5   :  { %p586_p0 = scmp.ne.s32.totalorder %s767_s0, %s585_s18  ;;  %p589_p1 = scmp.lt.u32.totalorder %s585_s18, %s767_s0 }
   0x7   :  { %p591_p2 = pnand %p589_p1, %p586_p0 }
   0x9   :  { %594 = shalt.err (!%p591_p2)
}
   0xa   :  { %s595_s23 = scalar_lea.vmem %s18_s13, 128  ;;  %p600_p4 = scmp.lt.s32.totalorder %s18_s13, %s18_s13 }
   0xb   :  { %p596_p3 = scmp.ne.s32.totalorder %s18_s13, %s595_s23  ;;  %p601_p5 = scmp.lt.s32.totalorder %s595_s23, %s595_s23 }
   0xd   :  { %p602_p6 = por %p601_p5, %p600_p4 }
   0xf   :  { %p603_p7 = pnand %p602_p6, %p596_p3 }
  0x11   :  { %606 = shalt.err (!%p603_p7)
}
  0x12   :  { %20 = dma.hbm_to_vmem [thread:$0]  %s767_s0, 128, %s18_s13, [#allocation3]  }
  0x13   :  { %s607_s28 = scalar_lea.hbm %s768_s1, 6144 }
  0x14   :  { %p608_p8 = scmp.ne.s32.totalorder %s768_s1, %s607_s28  ;;  %p611_p9 = scmp.lt.u32.totalorder %s607_s28, %s768_s1 }
  0x16   :  { %p613_p10 = pnand %p611_p9, %p608_p8 }
  0x18   :  { %616 = shalt.err (!%p613_p10)
}
  0x19   :  { %s617_s6 = scalar_lea.vmem %s685_s15, 6144  ;;  %p622_p12 = scmp.lt.s32.totalorder %s685_s15, %s685_s15 }
  0x1a   :  { %p618_p11 = scmp.ne.s32.totalorder %s685_s15, %s617_s6  ;;  %p623_p13 = scmp.lt.s32.totalorder %s617_s6, %s617_s6 }
  0x1c   :  { %p624_p0 = por %p623_p13, %p622_p12 }
  0x1e   :  { %p625_p1 = pnand %p624_p0, %p618_p11 }
  0x20   :  { %628 = shalt.err (!%p625_p1)
}
  0x21   :  { %s659_s0 = smov 128   ;;  %s660_s7 = smov 8  }
  0x22   :  { %32 = dma.hbm_to_vmem [thread:$0]  %s768_s1, 6144, %s685_s15, [#allocation6], %s659_s0, %s659_s0, %s660_s7  }
  0x23   :  { %651 = dma.done.wait [#allocation3], 128  }
  0x24   :  { %652 = vsyncadd [#allocation3], 4294967168 }
  0x25   :  { %653 = dma.done.wait [#allocation6], 6144  }
  0x26   :  { %654 = vsyncadd [#allocation6], 4294961152  ;;  %v661_v0 = vmov 0.0|0.0   ;;  %vm662_vm0 = vmmov 0   ;;  %v663_v1 = vmov 0.0   ;;  %v42_v2 = vld [vmem:[#allocation5] sm:$0xff] }
  0x27   :  { %505 = vmatprep.subr.bf16.mxu0 %v661_v0  ;;  %432 = vmatprep.mubr.msk.f32.mxu0 %vm662_vm0, %v663_v1  ;;  %v43_v3 = vld [vmem:[#allocation5 + $0x8] sm:$0xff]  ;;  %v44_v4 = vld [vmem:[#allocation5 + $0x10] sm:$0xff]  ;;  %v45_v6 = vld [vmem:[#allocation5 + $0x18] sm:$0xff]  ;;  %s664_s15 = smov [#allocation7]  }
  0x28   :  { %529 = vmatprep.subr.bf16.mxu1 %v661_v0  ;;  %467 = vmatprep.mubr.msk.f32.mxu1 %vm662_vm0, %v663_v1  ;;  %v506_v5 = vpack.c.bf16 %v43_v3, %v42_v2  ;;  %v509_v7 = vpack.c.bf16 %v45_v6, %v44_v4  ;;  %v46_v8 = vld [vmem:[#allocation5 + $0x20] sm:$0xff]  ;;  %v47_v9 = vld [vmem:[#allocation5 + $0x28] sm:$0xff]  ;;  %v139_v12 = vld [vmem:[#allocation5 + $0x90] sm:$0xff]  ;;  %s334_s16 = sshll.u32 %s664_s15, 4  ;;  %s335_s16 = int_to_ptr.vmem [resolvable:$true] %s334_s16 }
  0x29   :  { %v137_v10 = vld [vmem:[#allocation5 + $0x80] sm:$0xff]  ;;  %v138_v11 = vld [vmem:[#allocation5 + $0x88] sm:$0xff]  ;;  %v140_v13 = vld [vmem:[#allocation5 + $0x98] sm:$0xff]  ;;  %v512_v14 = vpack.c.bf16 %v47_v9, %v46_v8  ;;  %s629_s17 = scalar_lea.vmem %s335_s16, 128  ;;  %p634_p3 = scmp.lt.s32.totalorder %s335_s16, %s335_s16 }
  0x2a   :  { %507 = vmatpush3.bf16.msra.mxu0 %v506_v5  ;;  %v530_v15 = vpack.c.bf16 %v138_v11, %v137_v10  ;;  %v48_v16 = vld [vmem:[#allocation5 + $0x30] sm:$0xff]  ;;  %v49_v17 = vld [vmem:[#allocation5 + $0x38] sm:$0xff]  ;;  %v533_v18 = vpack.c.bf16 %v140_v13, %v139_v12  ;;  %v141_v19 = vld [vmem:[#allocation5 + $0xa0] sm:$0xff]  ;;  %p630_p2 = scmp.ne.s32.totalorder %s335_s16, %s629_s17  ;;  %p635_p4 = scmp.lt.s32.totalorder %s629_s17, %s629_s17 }
  0x2b   :  { %508 = vmatprep.subr.bf16.mxu0 %v661_v0  ;;  %v142_v20 = vld [vmem:[#allocation5 + $0xa8] sm:$0xff]  ;;  %v515_v21 = vpack.c.bf16 %v49_v17, %v48_v16  ;;  %v50_v22 = vld [vmem:[#allocation5 + $0x40] sm:$0xff]  ;;  %v143_v25 = vld [vmem:[#allocation5 + $0xb0] sm:$0xff] }
  0x2c   :  { %531 = vmatpush3.bf16.msra.mxu1 %v530_v15  ;;  %v51_v23 = vld [vmem:[#allocation5 + $0x48] sm:$0xff]  ;;  %v536_v24 = vpack.c.bf16 %v142_v20, %v141_v19  ;;  %v144_v26 = vld [vmem:[#allocation5 + $0xb8] sm:$0xff]  ;;  %v52_v28 = vld [vmem:[#allocation5 + $0x50] sm:$0xff]  ;;  %p636_p5 = por %p635_p4, %p634_p3 }
  0x2d   :  { %532 = vmatprep.subr.bf16.mxu1 %v661_v0  ;;  %v518_v27 = vpack.c.bf16 %v51_v23, %v50_v22  ;;  %v53_v29 = vld [vmem:[#allocation5 + $0x58] sm:$0xff]  ;;  %v539_v30 = vpack.c.bf16 %v144_v26, %v143_v25  ;;  %v145_v31 = vld [vmem:[#allocation5 + $0xc0] sm:$0xff]  ;;  %v146_v32 = vld [vmem:[#allocation5 + $0xc8] sm:$0xff] }
  0x2e   :  { %510 = vmatpush3.bf16.msra.mxu0 %v509_v7  ;;  %v521_v33 = vpack.c.bf16 %v53_v29, %v52_v28  ;;  %v54_v34 = vld [vmem:[#allocation5 + $0x60] sm:$0xff]  ;;  %v55_v35 = vld [vmem:[#allocation5 + $0x68] sm:$0xff]  ;;  %v542_v36 = vpack.c.bf16 %v146_v32, %v145_v31  ;;  %v147_v37 = vld [vmem:[#allocation5 + $0xd0] sm:$0xff]  ;;  %p637_p6 = pnand %p636_p5, %p630_p2 }
  0x2f   :  { %511 = vmatprep.subr.bf16.mxu0 %v661_v0  ;;  %v148_v38 = vld [vmem:[#allocation5 + $0xd8] sm:$0xff]  ;;  %v524_v39 = vpack.c.bf16 %v55_v35, %v54_v34  ;;  %v56_v40 = vld [vmem:[#allocation5 + $0x70] sm:$0xff]  ;;  %v149_v43 = vld [vmem:[#allocation5 + $0xe0] sm:$0xff] }
  0x30   :  { %534 = vmatpush3.bf16.msra.mxu1 %v533_v18  ;;  %v57_v41 = vld [vmem:[#allocation5 + $0x78] sm:$0xff]  ;;  %v545_v42 = vpack.c.bf16 %v148_v38, %v147_v37  ;;  %v150_v44 = vld [vmem:[#allocation5 + $0xe8] sm:$0xff]  ;;  %v151_v48 = vld [vmem:[#allocation5 + $0xf0] sm:$0xff] }
  0x31   :  { %535 = vmatprep.subr.bf16.mxu1 %v661_v0  ;;  %v527_v45 = vpack.c.bf16 %v57_v41, %v56_v40  ;;  %v548_v46 = vpack.c.bf16 %v150_v44, %v149_v43  ;;  %v41_v47 = vld [vmem:[#allocation2] sm:$0xff]  ;;  %v233_v51 = vld [vmem:[#allocation5 + $0x100] sm:$0xff]  ;;  %v234_v52 = vld [vmem:[#allocation5 + $0x108] sm:$0xff] }
  0x32   :  { %513 = vmatpush3.bf16.msra.mxu0 %v512_v14  ;;  %v152_v49 = vld [vmem:[#allocation5 + $0xf8] sm:$0xff]  ;;  %v235_v53 = vld [vmem:[#allocation5 + $0x110] sm:$0xff]  ;;  %v554_v54 = vpack.c.bf16 %v234_v52, %v233_v51  ;;  %v237_v57 = vld [vmem:[#allocation5 + $0x120] sm:$0xff] }
  0x33   :  { %514 = vmatprep.subr.bf16.mxu0 %v661_v0  ;;  %v551_v50 = vpack.c.bf16 %v152_v49, %v151_v48  ;;  %v236_v55 = vld [vmem:[#allocation5 + $0x118] sm:$0xff]  ;;  %v238_v58 = vld [vmem:[#allocation5 + $0x128] sm:$0xff]  ;;  %v239_v60 = vld [vmem:[#allocation5 + $0x130] sm:$0xff] }
  0x34   :  { %537 = vmatpush3.bf16.msra.mxu1 %v536_v24  ;;  %v557_v56 = vpack.c.bf16 %v236_v55, %v235_v53  ;;  %v560_v59 = vpack.c.bf16 %v238_v58, %v237_v57  ;;  %v240_v61 = vld [vmem:[#allocation5 + $0x138] sm:$0xff]  ;;  %v241_v63 = vld [vmem:[#allocation5 + $0x140] sm:$0xff]  ;;  %v243_v3 = vld [vmem:[#allocation5 + $0x150] sm:$0xff] }
  0x35   :  { %538 = vmatprep.subr.bf16.mxu1 %v661_v0  ;;  %v563_v62 = vpack.c.bf16 %v240_v61, %v239_v60  ;;  %v244_v4 = vld [vmem:[#allocation5 + $0x158] sm:$0xff]  ;;  %v245_v6 = vld [vmem:[#allocation5 + $0x160] sm:$0xff]  ;;  %v246_v7 = vld [vmem:[#allocation5 + $0x168] sm:$0xff] }
  0x36   :  { %516 = vmatpush3.bf16.msra.mxu0 %v515_v21  ;;  %v569_v5 = vpack.c.bf16 %v244_v4, %v243_v3  ;;  %v572_v8 = vpack.c.bf16 %v246_v7, %v245_v6  ;;  %v344_v9 = vld [vmem:[%s769_s2] ss:$0 sm:$0xff]  ;;  %v247_v14 = vld [vmem:[#allocation5 + $0x170] sm:$0xff]  ;;  %v346_v17 = vld [vmem:[%s769_s2 + $0x1] ss:$0 sm:$0xff] }
  0x37   :  { %517 = vmatprep.subr.bf16.mxu0 %v661_v0  ;;  %v248_v15 = vld [vmem:[#allocation5 + $0x178] sm:$0xff] }
  0x38   :  { %540 = vmatpush3.bf16.msra.mxu1 %v539_v30  ;;  %v575_v16 = vpack.c.bf16 %v248_v15, %v247_v14  ;;  %v348_v21 = vld [vmem:[%s769_s2 + $0x2] ss:$0 sm:$0xff] }
  0x39   :  { %541 = vmatprep.subr.bf16.mxu1 %v661_v0 }
  0x3a   :  { %519 = vmatpush3.bf16.msra.mxu0 %v518_v27 }
  0x3b   :  { %520 = vmatprep.subr.bf16.mxu0 %v661_v0 }
  0x3c   :  { %543 = vmatpush3.bf16.msra.mxu1 %v542_v36 }
  0x3d   :  { %544 = vmatprep.subr.bf16.mxu1 %v661_v0 }
  0x3e   :  { %522 = vmatpush3.bf16.msra.mxu0 %v521_v33 }
  0x3f   :  { %523 = vmatprep.subr.bf16.mxu0 %v661_v0 }
  0x40   :  { %546 = vmatpush3.bf16.msra.mxu1 %v545_v42 }
  0x41   :  { %547 = vmatprep.subr.bf16.mxu1 %v661_v0 }
  0x42   :  { %525 = vmatpush3.bf16.msra.mxu0 %v524_v39 }
  0x43   :  { %526 = vmatprep.subr.bf16.mxu0 %v661_v0 }
  0x44   :  { %549 = vmatpush3.bf16.msra.mxu1 %v548_v46 }
  0x45   :  { %550 = vmatprep.subr.bf16.mxu1 %v661_v0 }
  0x46   :  { %528 = vmatpush3.bf16.msra.mxu0 %v527_v45 }
  0x47   :  { %553 = vmatprep.subr.bf16.mxu0 %v661_v0 }
  0x48   :  { %552 = vmatpush3.bf16.msra.mxu1 %v551_v50 }
  0x49   :  { %433 = vmatmul.mubr.f32.vlgmr.msra.gmra.mrb[0].mxu0 %v41_v47 }
  0x4a   :  { %502 = vmatprep.mubr.msk.f32.mxu0 %vm662_vm0, %v663_v1  ;;  %555 = vmatpush3.bf16.msra.mxu0 %v554_v54  ;;  %v242_v1 = vld [vmem:[#allocation5 + $0x148] sm:$0xff] }
  0x4b   :  { %556 = vmatprep.subr.bf16.mxu0 %v661_v0  ;;  %v566_v2 = vpack.c.bf16 %v242_v1, %v241_v63 }
  0x4e   :  { %558 = vmatpush3.bf16.msra.mxu0 %v557_v56 }
  0x4f   :  { %559 = vmatprep.subr.bf16.mxu0 %v661_v0 }
  0x52   :  { %561 = vmatpush3.bf16.msra.mxu0 %v560_v59 }
  0x53   :  { %562 = vmatprep.subr.bf16.mxu0 %v661_v0 }
  0x56   :  { %564 = vmatpush3.bf16.msra.mxu0 %v563_v62 }
  0x57   :  { %565 = vmatprep.subr.bf16.mxu0 %v661_v0 }
  0x5a   :  { %567 = vmatpush3.bf16.msra.mxu0 %v566_v2 }
  0x5b   :  { %568 = vmatprep.subr.bf16.mxu0 %v661_v0 }
  0x5e   :  { %570 = vmatpush3.bf16.msra.mxu0 %v569_v5 }
  0x5f   :  { %571 = vmatprep.subr.bf16.mxu0 %v661_v0 }
  0x62   :  { %573 = vmatpush3.bf16.msra.mxu0 %v572_v8 }
  0x63   :  { %574 = vmatprep.subr.bf16.mxu0 %v661_v0 }
  0x66   :  { %576 = vmatpush3.bf16.msra.mxu0 %v575_v16 }
 0x11c   :  { %v131_v10 = vpop.f32.mrb[0].mxu0 }
 0x11d   :  { %v132_v11 = vadd.f32 %v344_v9, %v131_v10  ;;  %v434_v12 = vpop.f32.mrb[1].mxu0 }
 0x11f   :  { %v135_v13 = vmax.f32 %v132_v11, 0.0 }
 0x121   :  { %468 = vmatmul.mubr.f32.vlgmr.msra.gmra.mrb[0].mxu1 %v135_v13 }
 0x1f4   :  { %v227_v18 = vpop.f32.mrb[0].mxu1 }
 0x1f5   :  { %v228_v19 = vadd.f32 %v346_v17, %v227_v18  ;;  %v469_v0 = vpop.f32.mrb[1].mxu1 }
 0x1f7   :  { %v231_v20 = vmax.f32 %v228_v19, 0.0 }
 0x1f9   :  { %503 = vmatmul.mubr.f32.vlgmr.msra.gmra.mrb[2].mxu0 %v231_v20 }
 0x2cc   :  { %v323_v22 = vpop.f32.mrb[2].mxu0 }
 0x2cd   :  { %v324_v23 = vadd.f32 %v348_v21, %v323_v22  ;;  %v504_v24 = vpop.f32.mrb[3].mxu0 }
 0x2cf   :  { %327 = vst [vmem:[#allocation7] sm:$0xff] %v324_v23 }
 0x2d0   :  { %640 = shalt.err (!%p637_p6)
}
 0x2d1   :  { %s641_s20 = scalar_lea.hbm %s770_s3, 128 }
 0x2d2   :  { %p642_p7 = scmp.ne.s32.totalorder %s770_s3, %s641_s20  ;;  %p645_p8 = scmp.lt.u32.totalorder %s641_s20, %s770_s3 }
 0x2d4   :  { %p647_p9 = pnand %p645_p8, %p642_p7 }
 0x2d6   :  { %650 = shalt.err (!%p647_p9)
}
 0x2d7   :  { %337 = dma.vmem_to_hbm [thread:$0]  %s335_s16, 128, %s770_s3, [#allocation4]  }
 0x2d8   :  { %655 = dma.done.wait [#allocation4], 128  }
 0x2d9   :  { %656 = vsyncadd [#allocation4], 4294967168 }
 0x2da   :  { %341 = vsyncpa [#allocation3], 1 }
 0x2db   :  { %342 = vsyncpa [#allocation6], 1 }
 0x2dc   :  { %343 = vsyncpa [#allocation4], 1 }

</bundles_post_ra>
